<compile_context>
chip_gen: v7x
topology: tpu7x:2x2x1
jax: 0.10.0
libtpu: 0.0.40
codegen_flags: <defaults>
</compile_context>

<pallas_src>
import math
from functools import lru_cache

import jax
import jax.numpy as jnp
from jax.experimental import pallas as pl
from jax.experimental.pallas import tpu as pltpu


def _round_up(x, m):
    return ((x + m - 1) // m) * m


# --------------------------------------------------------------------------
# Generation-aware tile plan
# --------------------------------------------------------------------------
@lru_cache(maxsize=None)
def _tile_plan():
    vmem_cap = 64 << 20
    try:
        vmem_cap = int(pltpu.get_tpu_info().vmem_capacity_bytes)
    except Exception:
        pass
    kind = ""
    try:
        kind = jax.devices()[0].device_kind.lower()
    except Exception:
        pass
    is_v5e = ("v5 lite" in kind) or ("v5e" in kind) or ("v5lite" in kind)

    if vmem_cap <= (64 << 20):
        # v7x-class: 64 MiB VMEM/TC, 2 TCs, 3.2 TB/s HBM -> moderate tiles,
        # stay well under the physical 64 MiB per core.
        return {"tm": 512, "tn": 256, "tk": 2048,
                "vmem_limit": min(48 << 20, vmem_cap * 3 // 4)}
    if is_v5e:
        # v5e: 4x128^2 MXU, lowest HBM BW -> native 128-wide N tiles, favour
        # HBM-traffic reduction over MXU shaping.
        return {"tm": 512, "tn": 128, "tk": 1024, "vmem_limit": 64 << 20}
    # v6e-class (128 MiB VMEM, 2x256^2 MXU): big tiles, generous VMEM budget.
    return {"tm": 1024, "tn": 512, "tk": 2048, "vmem_limit": 96 << 20}


def _pick_tm(m, tm_max):
    """Prefer an M tile that covers or exactly divides m (no row padding)."""
    if m <= tm_max:
        return m, m                      # single full-dim block
    for tm in range(tm_max, 15, -16):    # largest multiple-of-16 divisor
        if m % tm == 0:
            return tm, m
    tm = tm_max                          # rare: pad + post-slice fallback
    return tm, _round_up(m, tm)


# --------------------------------------------------------------------------
# Fused GEMM + bias + ReLU kernels (BN scale pre-folded into the weights)
# --------------------------------------------------------------------------
def _gemm_bias_relu_kernel(p_ref, w_ref, b_ref, o_ref):
    """Single K step: dot -> +bias -> ReLU -> store (no VMEM accumulator)."""
    acc = jnp.dot(p_ref[...], w_ref[...], preferred_element_type=jnp.float32)
    o_ref[...] = jnp.maximum(acc + b_ref[...], 0.0).astype(o_ref.dtype)


def _gemm_bias_relu_acc_kernel(p_ref, w_ref, b_ref, o_ref, acc_ref):
    """K-tiled: f32 VMEM accumulator, epilogue applied once on the last step."""
    k = pl.program_id(2)

    @pl.when(k == 0)
    def _():
        acc_ref[...] = jnp.zeros_like(acc_ref)

    acc_ref[...] += jnp.dot(
        p_ref[...], w_ref[...], preferred_element_type=jnp.float32
    )

    @pl.when(k == pl.num_programs(2) - 1)
    def _():
        o_ref[...] = jnp.maximum(acc_ref[...] + b_ref[...], 0.0).astype(o_ref.dtype)


def _fused_gemm_bias_relu(patches, w2d, bias, out_dtype):
    """patches:[M,K], w2d:[K,Cout] (scale folded), bias:[Cout] ->
    ReLU(P@W + bias)[:M,:Cout] in out_dtype (f32 MXU accumulation)."""
    m, k = patches.shape
    _, cout = w2d.shape
    plan = _tile_plan()

    # ---- N (lane / output-channel) tiling: avoid padding when possible -----
    if cout <= plan["tn"]:
        tn, cout_pad = cout, cout        # full-dim block, no channel padding
    else:
        tn = plan["tn"]
        cout_pad = _round_up(cout, tn)

    # ---- K (contraction) tiling ---------------------------------------------
    if k <= plan["tk"]:
        tk, k_pad, k_tiled = k, k, False  # single K step, no accumulator
    else:
        tk = plan["tk"]
        k_pad, k_tiled = _round_up(k, tk), True

    # ---- M (row) tiling ------------------------------------------------------
    tm, m_pad = _pick_tm(m, plan["tm"])

    # ---- bf16 MXU operands; zero padding contributes nothing ----------------
    p = patches.astype(jnp.bfloat16)
    if (m_pad, k_pad) != (m, k):
        p = jnp.pad(p, ((0, m_pad - m), (0, k_pad - k)))
    w = w2d.astype(jnp.bfloat16)
    if (k_pad, cout_pad) != (k, cout):
        w = jnp.pad(w, ((0, k_pad - k), (0, cout_pad - cout)))
    b = bias.astype(jnp.float32).reshape(1, cout)
    if cout_pad != cout:
        b = jnp.pad(b, ((0, 0), (0, cout_pad - cout)))

    if not k_tiled:
        grid = (m_pad // tm, cout_pad // tn)
        out = pl.pallas_call(
            _gemm_bias_relu_kernel,
            out_shape=jax.ShapeDtypeStruct((m_pad, cout_pad), out_dtype),
            grid_spec=pltpu.PrefetchScalarGridSpec(
                num_scalar_prefetch=0,
                grid=grid,
                in_specs=[
                    pl.BlockSpec((tm, tk), lambda i, j: (i, 0)),   # patches
                    pl.BlockSpec((tk, tn), lambda i, j: (0, j)),   # weights
                    pl.BlockSpec((1, tn), lambda i, j: (0, j)),    # bias
                ],
                out_specs=pl.BlockSpec((tm, tn), lambda i, j: (i, j)),
            ),
            compiler_params=pltpu.CompilerParams(
                dimension_semantics=("parallel", "parallel"),
                vmem_limit_bytes=plan["vmem_limit"],
            ),
        )(p, w, b)
    else:
        grid = (m_pad // tm, cout_pad // tn, k_pad // tk)
        out = pl.pallas_call(
            _gemm_bias_relu_acc_kernel,
            out_shape=jax.ShapeDtypeStruct((m_pad, cout_pad), out_dtype),
            grid_spec=pltpu.PrefetchScalarGridSpec(
                num_scalar_prefetch=0,
                grid=grid,
                in_specs=[
                    pl.BlockSpec((tm, tk), lambda i, j, kk: (i, kk)),   # patches
                    pl.BlockSpec((tk, tn), lambda i, j, kk: (kk, j)),   # weights
                    pl.BlockSpec((1, tn), lambda i, j, kk: (0, j)),     # bias
                ],
                out_specs=pl.BlockSpec((tm, tn), lambda i, j, kk: (i, j)),
                scratch_shapes=[pltpu.VMEM((tm, tn), jnp.float32)],
            ),
            compiler_params=pltpu.CompilerParams(
                dimension_semantics=("parallel", "parallel", "arbitrary"),
                vmem_limit_bytes=plan["vmem_limit"],
            ),
        )(p, w, b)

    if (m_pad, cout_pad) != (m, cout):   # rare: only when padding was required
        out = out[:m, :cout]
    return out


# --------------------------------------------------------------------------
# im2col patch extraction (NHWC or NCHW input, single fused XLA gather, bf16)
# --------------------------------------------------------------------------
def _im2col(x, kh, kw, stride, padding, channels_last):
    if channels_last:
        n, h, w, c = x.shape
        xp = jnp.pad(x, ((0, 0), (padding, padding), (padding, padding), (0, 0)))
        ho = (h + 2 * padding - kh) // stride + 1
        wo = (w + 2 * padding - kw) // stride + 1
        taps = [xp[:, i:i + stride * ho:stride, j:j + stride * wo:stride, :]
                for i in range(kh) for j in range(kw)]
        patches = jnp.stack(taps, axis=3)                       # [N,Ho,Wo,KhKw,C]
    else:
        # NCHW input: the layout change is folded into this gather (no separate
        # full-activation transpose pass).
        n, c, h, w = x.shape
        xp = jnp.pad(x, ((0, 0), (0, 0), (padding, padding), (padding, padding)))
        ho = (h + 2 * padding - kh) // stride + 1
        wo = (w + 2 * padding - kw) // stride + 1
        taps = [xp[:, :, i:i + stride * ho:stride, j:j + stride * wo:stride]
                for i in range(kh) for j in range(kw)]
        patches = jnp.stack(taps, axis=-1)                      # [N,C,Ho,Wo,KhKw]
        patches = jnp.transpose(patches, (0, 2, 3, 4, 1))       # [N,Ho,Wo,KhKw,C]
    return patches.reshape(n * ho * wo, kh * kw * c), (n, ho, wo)


def conv_bn_relu(x, w, bias, *, stride, padding, channels_last=True,
                 out_dtype=jnp.bfloat16):
    """3x3 conv (BN scale already folded into `w`) + bias + ReLU.
    GEMM hot path runs in Pallas; activations flow in bf16."""
    kh, kw, cin, cout = w.shape
    x = x.astype(jnp.bfloat16)                   # cast BEFORE im2col (9x cheaper)
    patches, (n, ho, wo) = _im2col(x, kh, kw, stride, padding, channels_last)
    w2d = w.reshape(kh * kw * cin, cout)
    out = _fused_gemm_bias_relu(patches, w2d, bias, out_dtype)
    return out.reshape(n, ho, wo, cout)          # NHWC


def conv_bn_relu_ref(x, w, bias, *, stride, padding, channels_last=True,
                     out_dtype=jnp.bfloat16):
    """Pure-JAX reference with the same bf16 operands / f32 accumulation."""
    kh, kw, cin, cout = w.shape
    patches, (n, ho, wo) = _im2col(x.astype(jnp.bfloat16), kh, kw, stride,
                                   padding, channels_last)
    p = patches.astype(jnp.float32)
    w2d = w.astype(jnp.float32).reshape(kh * kw * cin, cout)
    y = jnp.maximum(p @ w2d + bias.astype(jnp.float32).reshape(1, cout), 0.0)
    return y.astype(out_dtype).reshape(n, ho, wo, cout)


# --------------------------------------------------------------------------
# TimmModel equivalent (synthetic 4-stage backbone)
# --------------------------------------------------------------------------
class TimmModelPallas:
    # synthetic feature_info of the backbone
    _MODULE_NAMES = ("stem", "stages_0", "stages_1", "stages_2")
    _REDUCTIONS = (2, 4, 8, 16)
    _CHANNELS = (16, 32, 64, 128)

    def __init__(self, return_layers, in_chans=4, seed=0):
        assert set(return_layers).issubset(set(self._MODULE_NAMES)), (
            f"return_layers should be a subset of {list(self._MODULE_NAMES)}"
        )
        self.return_layers = list(return_layers)
        self.return_idx = [self._MODULE_NAMES.index(n) for n in self.return_layers]
        self.strides = [self._REDUCTIONS[i] for i in self.return_idx]
        self.channels = [self._CHANNELS[i] for i in self.return_idx]

        # deterministic parameter init. Inference-time BN fold is done ONCE at
        # prep time: scale (= gamma/sqrt(var+eps)) is multiplied into the conv
        # weights, which are stored directly in bf16 (MXU input dtype); only a
        # per-channel bias survives into the kernel epilogue.
        key = jax.random.PRNGKey(seed)
        self.params = []
        cprev = in_chans
        for cout in self._CHANNELS:
            key, kw_, ks_, kb_ = jax.random.split(key, 4)
            fan_in = 3 * 3 * cprev
            w = jax.random.normal(kw_, (3, 3, cprev, cout), jnp.float32) / math.sqrt(fan_in)
            scale = 1.0 + 0.1 * jax.random.normal(ks_, (cout,), jnp.float32)
            bias = 0.1 * jax.random.normal(kb_, (cout,), jnp.float32)
            w_folded = (w * scale.reshape(1, 1, 1, cout)).astype(jnp.bfloat16)
            self.params.append((w_folded, bias))
            cprev = cout

        self._jit_forward = jax.jit(self._forward_impl)

    def _forward_impl(self, params, x_nchw):
        feats = {}
        x = x_nchw
        last = max(self.return_idx)
        for idx, (name, (w, bias)) in enumerate(zip(self._MODULE_NAMES, params)):
            if idx > last:
                break
            # stage 0 consumes NCHW directly (layout change folded into im2col);
            # intermediate feature maps stay bf16/NHWC between stages.
            x = conv_bn_relu(x, w, bias, stride=2, padding=1,
                             channels_last=(idx > 0), out_dtype=jnp.bfloat16)
            feats[name] = x
        # IntermediateLayerGetter semantics: ordered list of requested layer
        # outputs, NCHW f32 to match the PyTorch module's convention.
        # (single fused transpose+convert pass per returned feature)
        return [jnp.transpose(feats[n], (0, 3, 1, 2)).astype(jnp.float32)
                for n in self.return_layers]

    def forward(self, x_nchw):
        return self._jit_forward(self.params, x_nchw)

    __call__ = forward


if __name__ == "__main__":
    key = jax.random.PRNGKey(0)
    x = jax.random.normal(key, (2, 4, 16, 16), jnp.float32)  # NCHW, in_chans=4

    model = TimmModelPallas(
        return_layers=("stages_0", "stages_1", "stages_2"), in_chans=4, seed=0
    )
    outs = model(x)
    outs = jax.block_until_ready(outs)

    expected_shapes = [(2, 32, 4, 4), (2, 64, 2, 2), (2, 128, 1, 1)]
    got_shapes = [tuple(o.shape) for o in outs]
    assert got_shapes == expected_shapes, (got_shapes, expected_shapes)
    assert model.strides == [4, 8, 16] and model.channels == [32, 64, 128]
    assert all(bool(jnp.all(jnp.isfinite(o))) for o in outs)
    assert all(o.dtype == jnp.float32 for o in outs)

    # per-stage numeric check of the Pallas kernel against a pure-JAX reference
    cur = x
    for idx, (w, bias) in enumerate(model.params):
        cl = idx > 0
        y_kernel = conv_bn_relu(cur, w, bias, stride=2, padding=1, channels_last=cl)
        y_ref = conv_bn_relu_ref(cur, w, bias, stride=2, padding=1, channels_last=cl)
        err = float(jnp.max(jnp.abs(y_kernel.astype(jnp.float32)
                                    - y_ref.astype(jnp.float32))))
        assert err < 2e-2, (idx, err)
        cur = y_kernel

    # exercise the K-tiled accumulator kernel + channel-padding path directly
    plan = _tile_plan()
    mt, kt, ct = 96, plan["tk"] + 128, plan["tn"] + 32
    k1, k2, k3 = jax.random.split(jax.random.PRNGKey(1), 3)
    p_t = jax.random.normal(k1, (mt, kt), jnp.float32) / math.sqrt(kt)
    w_t = jax.random.normal(k2, (kt, ct), jnp.float32)
    b_t = 0.1 * jax.random.normal(k3, (ct,), jnp.float32)
    y_t = _fused_gemm_bias_relu(p_t, w_t, b_t, jnp.float32)
    p32 = p_t.astype(jnp.bfloat16).astype(jnp.float32)
    w32 = w_t.astype(jnp.bfloat16).astype(jnp.float32)
    y_rt = jnp.maximum(p32 @ w32 + b_t.reshape(1, ct), 0.0)
    err = float(jnp.max(jnp.abs(y_t - y_rt)))
    assert err < 1e-2, err

    print("KERNEL_OK")
</pallas_src>

<mosaic_0001>
module attributes {stable_mosaic.version = 11 : i64} {
  func.func @_gemm_bias_relu_kernel(%arg0: i32, %arg1: i32, %arg2: memref<128x36xbf16, #tpu.memory_space<vmem>>, %arg3: memref<36x16xbf16, #tpu.memory_space<vmem>>, %arg4: memref<1x16xf32, #tpu.memory_space<vmem>>, %arg5: memref<128x16xbf16, #tpu.memory_space<vmem>>) attributes {dimension_semantics = [#tpu.dimension_semantics<parallel>, #tpu.dimension_semantics<parallel>], iteration_bounds = array<i64: 1, 1>, scalar_prefetch = 0 : i64, scratch_operands = 0 : i64, tpu.core_type = #tpu.core_type<tc>, window_params = [{transform_indices = @transform_0, window_bounds = array<i64: 128, 36>}, {transform_indices = @transform_1, window_bounds = array<i64: 36, 16>}, {transform_indices = @transform_2, window_bounds = array<i64: 1, 16>}, {transform_indices = @transform_3, window_bounds = array<i64: 128, 16>}]} {
    %c0 = arith.constant 0 : index
    %c0_0 = arith.constant 0 : index
    %0 = vector.load %arg2[%c0, %c0_0] : memref<128x36xbf16, #tpu.memory_space<vmem>>, vector<128x36xbf16>
    %c0_1 = arith.constant 0 : index
    %c0_2 = arith.constant 0 : index
    %1 = vector.load %arg3[%c0_1, %c0_2] : memref<36x16xbf16, #tpu.memory_space<vmem>>, vector<36x16xbf16>
    %cst = arith.constant dense<0.000000e+00> : vector<128x16xf32>
    %2 = tpu.matmul %0, %1, %cst {dimension_numbers = #tpu.dot_dimension_numbers<[1], [0], [0], [1], [0, 0, 1, 1], [], []>} : vector<128x36xbf16>, vector<36x16xbf16>, vector<128x16xf32> -> vector<128x16xf32>
    %c0_3 = arith.constant 0 : index
    %c0_4 = arith.constant 0 : index
    %3 = vector.load %arg4[%c0_3, %c0_4] : memref<1x16xf32, #tpu.memory_space<vmem>>, vector<1x16xf32>
    %4 = vector.broadcast %3 : vector<1x16xf32> to vector<128x16xf32>
    %5 = arith.addf %2, %4 : vector<128x16xf32>
    %cst_5 = arith.constant 0.000000e+00 : f32
    %6 = vector.broadcast %cst_5 : f32 to vector<128x16xf32>
    %7 = arith.maximumf %5, %6 : vector<128x16xf32>
    %8 = arith.truncf %7 : vector<128x16xf32> to vector<128x16xbf16>
    %c0_6 = arith.constant 0 : index
    %c0_7 = arith.constant 0 : index
    %9 = vector.load %arg5[%c0_6, %c0_7] : memref<128x16xbf16, #tpu.memory_space<vmem>>, vector<128x16xbf16>
    tpu.vector_store %arg5[%c0_6, %c0_7], %8 {strides = array<i32>} : memref<128x16xbf16, #tpu.memory_space<vmem>>, vector<128x16xbf16>,
    return
  }
  func.func @transform_0(%arg0: i32, %arg1: i32) -> (i32, i32) {
    %c0_i32 = arith.constant 0 : i32
    %c0_i32_0 = arith.constant 0 : i32
    return %arg0, %c0_i32 : i32, i32
  }
  func.func @transform_1(%arg0: i32, %arg1: i32) -> (i32, i32) {
    %c0_i32 = arith.constant 0 : i32
    %c0_i32_0 = arith.constant 0 : i32
    return %c0_i32, %arg1 : i32, i32
  }
  func.func @transform_2(%arg0: i32, %arg1: i32) -> (i32, i32) {
    %c0_i32 = arith.constant 0 : i32
    %c0_i32_0 = arith.constant 0 : i32
    return %c0_i32, %arg1 : i32, i32
  }
  func.func @transform_3(%arg0: i32, %arg1: i32) -> (i32, i32) {
    %c0_i32 = arith.constant 0 : i32
    return %arg0, %arg1 : i32, i32
  }
}

module attributes {stable_mosaic.version = 11 : i64} {
  func.func @_gemm_bias_relu_kernel(%arg0: i32, %arg1: i32, %arg2: memref<32x144xbf16, #tpu.memory_space<vmem>>, %arg3: memref<144x32xbf16, #tpu.memory_space<vmem>>, %arg4: memref<1x32xf32, #tpu.memory_space<vmem>>, %arg5: memref<32x32xbf16, #tpu.memory_space<vmem>>) attributes {dimension_semantics = [#tpu.dimension_semantics<parallel>, #tpu.dimension_semantics<parallel>], iteration_bounds = array<i64: 1, 1>, scalar_prefetch = 0 : i64, scratch_operands = 0 : i64, tpu.core_type = #tpu.core_type<tc>, window_params = [{transform_indices = @transform_0, window_bounds = array<i64: 32, 144>}, {transform_indices = @transform_1, window_bounds = array<i64: 144, 32>}, {transform_indices = @transform_2, window_bounds = array<i64: 1, 32>}, {transform_indices = @transform_3, window_bounds = array<i64: 32, 32>}]} {
    %c0 = arith.constant 0 : index
    %c0_0 = arith.constant 0 : index
    %0 = vector.load %arg2[%c0, %c0_0] : memref<32x144xbf16, #tpu.memory_space<vmem>>, vector<32x144xbf16>
    %c0_1 = arith.constant 0 : index
    %c0_2 = arith.constant 0 : index
    %1 = vector.load %arg3[%c0_1, %c0_2] : memref<144x32xbf16, #tpu.memory_space<vmem>>, vector<144x32xbf16>
    %cst = arith.constant dense<0.000000e+00> : vector<32x32xf32>
    %2 = tpu.matmul %0, %1, %cst {dimension_numbers = #tpu.dot_dimension_numbers<[1], [0], [0], [1], [0, 0, 1, 1], [], []>} : vector<32x144xbf16>, vector<144x32xbf16>, vector<32x32xf32> -> vector<32x32xf32>
    %c0_3 = arith.constant 0 : index
    %c0_4 = arith.constant 0 : index
    %3 = vector.load %arg4[%c0_3, %c0_4] : memref<1x32xf32, #tpu.memory_space<vmem>>, vector<1x32xf32>
    %4 = vector.broadcast %3 : vector<1x32xf32> to vector<32x32xf32>
    %5 = arith.addf %2, %4 : vector<32x32xf32>
    %cst_5 = arith.constant 0.000000e+00 : f32
    %6 = vector.broadcast %cst_5 : f32 to vector<32x32xf32>
    %7 = arith.maximumf %5, %6 : vector<32x32xf32>
    %8 = arith.truncf %7 : vector<32x32xf32> to vector<32x32xbf16>
    %c0_6 = arith.constant 0 : index
    %c0_7 = arith.constant 0 : index
    %9 = vector.load %arg5[%c0_6, %c0_7] : memref<32x32xbf16, #tpu.memory_space<vmem>>, vector<32x32xbf16>
    tpu.vector_store %arg5[%c0_6, %c0_7], %8 {strides = array<i32>} : memref<32x32xbf16, #tpu.memory_space<vmem>>, vector<32x32xbf16>,
    return
  }
  func.func @transform_0(%arg0: i32, %arg1: i32) -> (i32, i32) {
    %c0_i32 = arith.constant 0 : i32
    %c0_i32_0 = arith.constant 0 : i32
    return %arg0, %c0_i32 : i32, i32
  }
  func.func @transform_1(%arg0: i32, %arg1: i32) -> (i32, i32) {
    %c0_i32 = arith.constant 0 : i32
    %c0_i32_0 = arith.constant 0 : i32
    return %c0_i32, %arg1 : i32, i32
  }
  func.func @transform_2(%arg0: i32, %arg1: i32) -> (i32, i32) {
    %c0_i32 = arith.constant 0 : i32
    %c0_i32_0 = arith.constant 0 : i32
    return %c0_i32, %arg1 : i32, i32
  }
  func.func @transform_3(%arg0: i32, %arg1: i32) -> (i32, i32) {
    %c0_i32 = arith.constant 0 : i32
    return %arg0, %arg1 : i32, i32
  }
}

module attributes {stable_mosaic.version = 11 : i64} {
  func.func @_gemm_bias_relu_kernel(%arg0: i32, %arg1: i32, %arg2: memref<8x288xbf16, #tpu.memory_space<vmem>>, %arg3: memref<288x64xbf16, #tpu.memory_space<vmem>>, %arg4: memref<1x64xf32, #tpu.memory_space<vmem>>, %arg5: memref<8x64xbf16, #tpu.memory_space<vmem>>) attributes {dimension_semantics = [#tpu.dimension_semantics<parallel>, #tpu.dimension_semantics<parallel>], iteration_bounds = array<i64: 1, 1>, scalar_prefetch = 0 : i64, scratch_operands = 0 : i64, tpu.core_type = #tpu.core_type<tc>, window_params = [{transform_indices = @transform_0, window_bounds = array<i64: 8, 288>}, {transform_indices = @transform_1, window_bounds = array<i64: 288, 64>}, {transform_indices = @transform_2, window_bounds = array<i64: 1, 64>}, {transform_indices = @transform_3, window_bounds = array<i64: 8, 64>}]} {
    %c0 = arith.constant 0 : index
    %c0_0 = arith.constant 0 : index
    %0 = vector.load %arg2[%c0, %c0_0] : memref<8x288xbf16, #tpu.memory_space<vmem>>, vector<8x288xbf16>
    %c0_1 = arith.constant 0 : index
    %c0_2 = arith.constant 0 : index
    %1 = vector.load %arg3[%c0_1, %c0_2] : memref<288x64xbf16, #tpu.memory_space<vmem>>, vector<288x64xbf16>
    %cst = arith.constant dense<0.000000e+00> : vector<8x64xf32>
    %2 = tpu.matmul %0, %1, %cst {dimension_numbers = #tpu.dot_dimension_numbers<[1], [0], [0], [1], [0, 0, 1, 1], [], []>} : vector<8x288xbf16>, vector<288x64xbf16>, vector<8x64xf32> -> vector<8x64xf32>
    %c0_3 = arith.constant 0 : index
    %c0_4 = arith.constant 0 : index
    %3 = vector.load %arg4[%c0_3, %c0_4] : memref<1x64xf32, #tpu.memory_space<vmem>>, vector<1x64xf32>
    %4 = vector.broadcast %3 : vector<1x64xf32> to vector<8x64xf32>
    %5 = arith.addf %2, %4 : vector<8x64xf32>
    %cst_5 = arith.constant 0.000000e+00 : f32
    %6 = vector.broadcast %cst_5 : f32 to vector<8x64xf32>
    %7 = arith.maximumf %5, %6 : vector<8x64xf32>
    %8 = arith.truncf %7 : vector<8x64xf32> to vector<8x64xbf16>
    %c0_6 = arith.constant 0 : index
    %c0_7 = arith.constant 0 : index
    %9 = vector.load %arg5[%c0_6, %c0_7] : memref<8x64xbf16, #tpu.memory_space<vmem>>, vector<8x64xbf16>
    tpu.vector_store %arg5[%c0_6, %c0_7], %8 {strides = array<i32>} : memref<8x64xbf16, #tpu.memory_space<vmem>>, vector<8x64xbf16>,
    return
  }
  func.func @transform_0(%arg0: i32, %arg1: i32) -> (i32, i32) {
    %c0_i32 = arith.constant 0 : i32
    %c0_i32_0 = arith.constant 0 : i32
    return %arg0, %c0_i32 : i32, i32
  }
  func.func @transform_1(%arg0: i32, %arg1: i32) -> (i32, i32) {
    %c0_i32 = arith.constant 0 : i32
    %c0_i32_0 = arith.constant 0 : i32
    return %c0_i32, %arg1 : i32, i32
  }
  func.func @transform_2(%arg0: i32, %arg1: i32) -> (i32, i32) {
    %c0_i32 = arith.constant 0 : i32
    %c0_i32_0 = arith.constant 0 : i32
    return %c0_i32, %arg1 : i32, i32
  }
  func.func @transform_3(%arg0: i32, %arg1: i32) -> (i32, i32) {
    %c0_i32 = arith.constant 0 : i32
    return %arg0, %arg1 : i32, i32
  }
}

module attributes {stable_mosaic.version = 11 : i64} {
  func.func @_gemm_bias_relu_kernel(%arg0: i32, %arg1: i32, %arg2: memref<2x576xbf16, #tpu.memory_space<vmem>>, %arg3: memref<576x128xbf16, #tpu.memory_space<vmem>>, %arg4: memref<1x128xf32, #tpu.memory_space<vmem>>, %arg5: memref<2x128xbf16, #tpu.memory_space<vmem>>) attributes {dimension_semantics = [#tpu.dimension_semantics<parallel>, #tpu.dimension_semantics<parallel>], iteration_bounds = array<i64: 1, 1>, scalar_prefetch = 0 : i64, scratch_operands = 0 : i64, tpu.core_type = #tpu.core_type<tc>, window_params = [{transform_indices = @transform_0, window_bounds = array<i64: 2, 576>}, {transform_indices = @transform_1, window_bounds = array<i64: 576, 128>}, {transform_indices = @transform_2, window_bounds = array<i64: 1, 128>}, {transform_indices = @transform_3, window_bounds = array<i64: 2, 128>}]} {
    %c0 = arith.constant 0 : index
    %c0_0 = arith.constant 0 : index
    %0 = vector.load %arg2[%c0, %c0_0] : memref<2x576xbf16, #tpu.memory_space<vmem>>, vector<2x576xbf16>
    %c0_1 = arith.constant 0 : index
    %c0_2 = arith.constant 0 : index
    %1 = vector.load %arg3[%c0_1, %c0_2] : memref<576x128xbf16, #tpu.memory_space<vmem>>, vector<576x128xbf16>
    %cst = arith.constant dense<0.000000e+00> : vector<2x128xf32>
    %2 = tpu.matmul %0, %1, %cst {dimension_numbers = #tpu.dot_dimension_numbers<[1], [0], [0], [1], [0, 0, 1, 1], [], []>} : vector<2x576xbf16>, vector<576x128xbf16>, vector<2x128xf32> -> vector<2x128xf32>
    %c0_3 = arith.constant 0 : index
    %c0_4 = arith.constant 0 : index
    %3 = vector.load %arg4[%c0_3, %c0_4] : memref<1x128xf32, #tpu.memory_space<vmem>>, vector<1x128xf32>
    %4 = vector.broadcast %3 : vector<1x128xf32> to vector<2x128xf32>
    %5 = arith.addf %2, %4 : vector<2x128xf32>
    %cst_5 = arith.constant 0.000000e+00 : f32
    %6 = vector.broadcast %cst_5 : f32 to vector<2x128xf32>
    %7 = arith.maximumf %5, %6 : vector<2x128xf32>
    %8 = arith.truncf %7 : vector<2x128xf32> to vector<2x128xbf16>
    %c0_6 = arith.constant 0 : index
    %c0_7 = arith.constant 0 : index
    %9 = vector.load %arg5[%c0_6, %c0_7] : memref<2x128xbf16, #tpu.memory_space<vmem>>, vector<2x128xbf16>
    tpu.vector_store %arg5[%c0_6, %c0_7], %8 {strides = array<i32>} : memref<2x128xbf16, #tpu.memory_space<vmem>>, vector<2x128xbf16>,
    return
  }
  func.func @transform_0(%arg0: i32, %arg1: i32) -> (i32, i32) {
    %c0_i32 = arith.constant 0 : i32
    %c0_i32_0 = arith.constant 0 : i32
    return %arg0, %c0_i32 : i32, i32
  }
  func.func @transform_1(%arg0: i32, %arg1: i32) -> (i32, i32) {
    %c0_i32 = arith.constant 0 : i32
    %c0_i32_0 = arith.constant 0 : i32
    return %c0_i32, %arg1 : i32, i32
  }
  func.func @transform_2(%arg0: i32, %arg1: i32) -> (i32, i32) {
    %c0_i32 = arith.constant 0 : i32
    %c0_i32_0 = arith.constant 0 : i32
    return %c0_i32, %arg1 : i32, i32
  }
  func.func @transform_3(%arg0: i32, %arg1: i32) -> (i32, i32) {
    %c0_i32 = arith.constant 0 : i32
    return %arg0, %arg1 : i32, i32
  }
}

</mosaic_0001>

<bundles_post_ra>
// kernel: _forward_impl.4
= control target key start
LH: loop header
LB: loop body
LE: loop exit
PB: predicated region body
PF: predicated region fallthrough
CT: control target
= control target key end

     0   :  { %vm98_vm0 = vcmask 293888   ;;  %vm123_vm1 = vcmask 1041408   ;;  %vm304_vm2 = vcmask 125952   ;;  %s557_s1 = inlined_call_operand.vmem [shape: bf16[36,16], index: 1, kind: input, shape index: {}]   ;;  %s558_s0 = inlined_call_operand.vmem [shape: bf16[128,36], index: 0, kind: input, shape index: {}]   ;;  %s559_s2 = inlined_call_operand.vmem [shape: f32[1,16], index: 2, kind: input, shape index: {}]   ;;  %s560_s3 = inlined_call_operand.vmem [shape: bf16[128,16], index: 3, kind: output, shape index: {}]  }
   0x1   :  { %v418_v0 = vld [vmem:[%s557_s1] sm:$0xff]   ;;  %v419_v1 = vld [vmem:[%s557_s1 + $0x8] sm:$0xff]   ;;  %v420_v2 = vld [vmem:[%s557_s1 + $0x10] ss:$0 sps:$4 sm:$0x33]  }
   0x2   :  { %388 = vmatprep.subr.bf16.mxu0 %v418_v0  ;;  %410 = vmatprep.subr.bf16.mxu1 %v418_v0  ;;  %v421_v3 = vld [vmem:[%s558_s0] sm:$0xff]   ;;  %v125_v5 = vsel %vm123_vm1, %v420_v2, 0  ;;  %v423_v6 = vld [vmem:[%s558_s0 + $0x8] sm:$0xff]   ;;  %v425_v8 = vld [vmem:[%s558_s0 + $0x10] sm:$0xff]  }
   0x3   :  { %389 = vmatpush3.bf16.msra.mxu0 %v418_v0  ;;  %413 = vmatpush3.bf16.msra.mxu1 %v418_v0  ;;  %v422_v4 = vld [vmem:[%s558_s0 + $0x20] sm:$0xff]   ;;  %v424_v7 = vld [vmem:[%s558_s0 + $0x28] sm:$0xff]   ;;  %v426_v9 = vld [vmem:[%s558_s0 + $0x30] sm:$0xff]  }
   0x4   :  { %390 = vmatprep.subr.bf16.mxu0 %v419_v1  ;;  %411 = vmatprep.subr.bf16.mxu1 %v419_v1  ;;  %v427_v10 = vld [vmem:[%s558_s0 + $0x18] sm:$0xff]   ;;  %v325_v12 = vld [vmem:[%s559_s2] ss:$0 sm:$0xff] }
   0x5   :  { %394 = vmatprep.mubr.msk.bf16.mxu0 %vm98_vm0, %v421_v3  ;;  %402 = vmatprep.mubr.msk.bf16.mxu1 %vm98_vm0, %v422_v4  ;;  %v428_v11 = vld [vmem:[%s558_s0 + $0x38] sm:$0xff]  }
   0x7   :  { %391 = vmatpush3.bf16.msra.mxu0 %v419_v1  ;;  %414 = vmatpush3.bf16.msra.mxu1 %v419_v1 }
   0x8   :  { %416 = vmatprep.subr.msk.bf16.mxu0 %vm123_vm1, %v420_v2  ;;  %417 = vmatprep.subr.msk.bf16.mxu1 %vm123_vm1, %v420_v2 }
   0xb   :  { %393 = vmatpush3.bf16.msra.mxu0 %v125_v5  ;;  %415 = vmatpush3.bf16.msra.mxu1 %v125_v5 }
   0xe   :  { %395 = vmatmul.mubr.msk.bf16.vlgmr.msra.gmra.mrb[0].mxu0 %vm98_vm0, %v423_v6  ;;  %403 = vmatmul.mubr.msk.bf16.vlgmr.msra.gmra.mrb[0].mxu1 %vm98_vm0, %v424_v7 }
   0xf   :  { %398 = vmatprep.mubr.msk.bf16.mxu0 %vm98_vm0, %v425_v8  ;;  %406 = vmatprep.mubr.msk.bf16.mxu1 %vm98_vm0, %v426_v9 }
  0x16   :  { %399 = vmatmul.mubr.msk.bf16.gmra.mrb[4].mxu0 %vm98_vm0, %v427_v10  ;;  %407 = vmatmul.mubr.msk.bf16.gmra.mrb[4].mxu1 %vm98_vm0, %v428_v11 }
  0xe1   :  { %v396_v13 = vpop.f32.mrb[0].mxu0  ;;  %v404_v14 = vpop.f32.mrb[0].mxu1 }
  0xe2   :  { %v170_v15 = vadd.f32 %v396_v13, %v325_v12  ;;  %v202_v16 = vadd.f32 %v404_v14, %v325_v12  ;;  %v161_v17 = vpop.f32.mrb[1].mxu0  ;;  %v193_v18 = vpop.f32.mrb[1].mxu1 }
  0xe3   :  { %v162_v19 = vadd.f32 %v325_v12, %v161_v17  ;;  %v194_v20 = vadd.f32 %v325_v12, %v193_v18  ;;  %v397_v21 = vpop.f32.mrb[2].mxu0  ;;  %v405_v22 = vpop.f32.mrb[2].mxu1 }
  0xe4   :  { %v226_v23 = vmax.f32 %v170_v15, 0.0  ;;  %v234_v24 = vmax.f32 %v202_v16, 0.0  ;;  %v173_v25 = vadd.f32 %v397_v21, %v325_v12  ;;  %v205_v26 = vadd.f32 %v405_v22, %v325_v12  ;;  %v164_v27 = vpop.f32.mrb[3].mxu0  ;;  %v196_v28 = vpop.f32.mrb[3].mxu1 }
  0xe5   :  { %v224_v29 = vmax.f32 %v162_v19, 0.0  ;;  %v232_v30 = vmax.f32 %v194_v20, 0.0  ;;  %v165_v31 = vadd.f32 %v325_v12, %v164_v27  ;;  %v197_v32 = vadd.f32 %v325_v12, %v196_v28 }
  0xe6   :  { %v363_v33 = vpack.c.bf16 %v226_v23, %v226_v23  ;;  %v371_v34 = vpack.c.bf16 %v234_v24, %v234_v24  ;;  %v227_v35 = vmax.f32 %v173_v25, 0.0  ;;  %v235_v36 = vmax.f32 %v205_v26, 0.0 }
  0xe7   :  { %v361_v37 = vpack.c.bf16 %v224_v29, %v224_v29  ;;  %v369_v38 = vpack.c.bf16 %v232_v30, %v232_v30  ;;  %v225_v39 = vmax.f32 %v165_v31, 0.0  ;;  %v233_v40 = vmax.f32 %v197_v32, 0.0 }
  0xe8   :  { %307 = vst.msk [vmem:[%s560_s3 + $0x8] sm:$0xf] %vm304_vm2, %v363_v33  ;;  %315 = vst.msk [vmem:[%s560_s3 + $0x28] sm:$0xf] %vm304_vm2, %v371_v34  ;;  %v364_v41 = vpack.c.bf16 %v227_v35, %v227_v35  ;;  %v372_v42 = vpack.c.bf16 %v235_v36, %v235_v36 }
  0xe9   :  { %305 = vst.msk [vmem:[%s560_s3] sm:$0xf] %vm304_vm2, %v361_v37  ;;  %313 = vst.msk [vmem:[%s560_s3 + $0x20] sm:$0xf] %vm304_vm2, %v369_v38  ;;  %v362_v43 = vpack.c.bf16 %v225_v39, %v225_v39  ;;  %v370_v44 = vpack.c.bf16 %v233_v40, %v233_v40  ;;  %v400_v45 = vpop.f32.mrb[4].mxu0  ;;  %v408_v46 = vpop.f32.mrb[4].mxu1 }
  0xea   :  { %308 = vst.msk [vmem:[%s560_s3 + $0xc] sm:$0xf] %vm304_vm2, %v364_v41  ;;  %316 = vst.msk [vmem:[%s560_s3 + $0x2c] sm:$0xf] %vm304_vm2, %v372_v42  ;;  %v186_v47 = vadd.f32 %v400_v45, %v325_v12  ;;  %v218_v48 = vadd.f32 %v408_v46, %v325_v12  ;;  %v177_v49 = vpop.f32.mrb[5].mxu0  ;;  %v209_v50 = vpop.f32.mrb[5].mxu1 }
  0xeb   :  { %306 = vst.msk [vmem:[%s560_s3 + $0x4] sm:$0xf] %vm304_vm2, %v362_v43  ;;  %314 = vst.msk [vmem:[%s560_s3 + $0x24] sm:$0xf] %vm304_vm2, %v370_v44  ;;  %v178_v51 = vadd.f32 %v325_v12, %v177_v49  ;;  %v210_v52 = vadd.f32 %v325_v12, %v209_v50  ;;  %v401_v53 = vpop.f32.mrb[6].mxu0  ;;  %v409_v54 = vpop.f32.mrb[6].mxu1 }
  0xec   :  { %v230_v55 = vmax.f32 %v186_v47, 0.0  ;;  %v238_v56 = vmax.f32 %v218_v48, 0.0  ;;  %v189_v57 = vadd.f32 %v401_v53, %v325_v12  ;;  %v221_v58 = vadd.f32 %v409_v54, %v325_v12  ;;  %v180_v59 = vpop.f32.mrb[7].mxu0  ;;  %v212_v60 = vpop.f32.mrb[7].mxu1 }
  0xed   :  { %v228_v61 = vmax.f32 %v178_v51, 0.0  ;;  %v236_v62 = vmax.f32 %v210_v52, 0.0  ;;  %v181_v63 = vadd.f32 %v325_v12, %v180_v59  ;;  %v213_v0 = vadd.f32 %v325_v12, %v212_v60 }
  0xee   :  { %v367_v1 = vpack.c.bf16 %v230_v55, %v230_v55  ;;  %v375_v2 = vpack.c.bf16 %v238_v56, %v238_v56  ;;  %v231_v3 = vmax.f32 %v189_v57, 0.0  ;;  %v239_v4 = vmax.f32 %v221_v58, 0.0 }
  0xef   :  { %v365_v5 = vpack.c.bf16 %v228_v61, %v228_v61  ;;  %v373_v6 = vpack.c.bf16 %v236_v62, %v236_v62  ;;  %v229_v7 = vmax.f32 %v181_v63, 0.0  ;;  %v237_v8 = vmax.f32 %v213_v0, 0.0 }
  0xf0   :  { %311 = vst.msk [vmem:[%s560_s3 + $0x18] sm:$0xf] %vm304_vm2, %v367_v1  ;;  %319 = vst.msk [vmem:[%s560_s3 + $0x38] sm:$0xf] %vm304_vm2, %v375_v2  ;;  %v368_v9 = vpack.c.bf16 %v231_v3, %v231_v3  ;;  %v376_v10 = vpack.c.bf16 %v239_v4, %v239_v4 }
  0xf1   :  { %309 = vst.msk [vmem:[%s560_s3 + $0x10] sm:$0xf] %vm304_vm2, %v365_v5  ;;  %317 = vst.msk [vmem:[%s560_s3 + $0x30] sm:$0xf] %vm304_vm2, %v373_v6  ;;  %v366_v11 = vpack.c.bf16 %v229_v7, %v229_v7  ;;  %v374_v12 = vpack.c.bf16 %v237_v8, %v237_v8 }
  0xf2   :  { %312 = vst.msk [vmem:[%s560_s3 + $0x1c] sm:$0xf] %vm304_vm2, %v368_v9  ;;  %320 = vst.msk [vmem:[%s560_s3 + $0x3c] sm:$0xf] %vm304_vm2, %v376_v10 }
  0xf3   :  { %310 = vst.msk [vmem:[%s560_s3 + $0x14] sm:$0xf] %vm304_vm2, %v366_v11  ;;  %318 = vst.msk [vmem:[%s560_s3 + $0x34] sm:$0xf] %vm304_vm2, %v374_v12 }

// kernel: _forward_impl.5
= control target key start
LH: loop header
LB: loop body
LE: loop exit
PB: predicated region body
PF: predicated region fallthrough
CT: control target
= control target key end

     0   :  { %v259_v0 = vmov 0   ;;  %vm116_vm0 = vcmask 130048   ;;  %vm192_vm1 = vcmask 257024   ;;  %s334_s1 = inlined_call_operand.vmem [shape: bf16[144,32], index: 1, kind: input, shape index: {}]   ;;  %s335_s0 = inlined_call_operand.vmem [shape: bf16[32,144], index: 0, kind: input, shape index: {}]   ;;  %s336_s2 = inlined_call_operand.vmem [shape: f32[1,32], index: 2, kind: input, shape index: {}]   ;;  %s337_s3 = inlined_call_operand.vmem [shape: bf16[32,32], index: 3, kind: output, shape index: {}]  }
   0x1   :  { %123 = vmatprep.subr.bf16.mxu0 %v259_v0  ;;  %225 = vmatprep.subr.bf16.mxu1 %v259_v0  ;;  %v244_v1 = vld [vmem:[%s334_s1] sm:$0xff]   ;;  %v245_v2 = vld [vmem:[%s334_s1 + $0x8] sm:$0xff]   ;;  %v246_v3 = vld [vmem:[%s334_s1 + $0x10] sm:$0xff]  }
   0x2   :  { %124 = vmatpush1.bf16.msra.mxu0 %v244_v1  ;;  %234 = vmatpush1.bf16.msra.mxu1 %v244_v1  ;;  %v247_v4 = vld [vmem:[%s334_s1 + $0x18] sm:$0xff]   ;;  %v255_v5 = vld [vmem:[%s335_s0 + $0x4] ss:$8 sps:$4 sm:$0xff]   ;;  %v250_v9 = vld [vmem:[%s334_s1 + $0x30] sm:$0xff]  }
   0x3   :  { %125 = vmatprep.subr.bf16.mxu0 %v259_v0  ;;  %226 = vmatprep.subr.bf16.mxu1 %v259_v0  ;;  %v258_v6 = vld [vmem:[%s335_s0 + $0x14] ss:$8 sps:$4 sm:$0xff]   ;;  %v248_v7 = vld [vmem:[%s334_s1 + $0x20] sm:$0xff]   ;;  %v249_v8 = vld [vmem:[%s334_s1 + $0x28] sm:$0xff]  }
   0x4   :  { %215 = vmatprep.mubr.msk.bf16.mxu0 %vm116_vm0, %v255_v5  ;;  %216 = vmatprep.mubr.msk.bf16.mxu1 %vm116_vm0, %v258_v6  ;;  %v251_v10 = vld [vmem:[%s334_s1 + $0x38] sm:$0xff]   ;;  %v252_v11 = vld [vmem:[%s334_s1 + $0x40] sm:$0xff]  }
   0x5   :  { %v253_v12 = vld [vmem:[%s335_s0] ss:$8 sps:$4 sm:$0xff]   ;;  %v256_v13 = vld [vmem:[%s335_s0 + $0x10] ss:$8 sps:$4 sm:$0xff]  }
   0x6   :  { %126 = vmatpush1.bf16.msra.mxu0 %v245_v2  ;;  %235 = vmatpush1.bf16.msra.mxu1 %v245_v2  ;;  %v201_v14 = vld [vmem:[%s336_s2] ss:$0 sm:$0xff] }
   0x7   :  { %127 = vmatprep.subr.bf16.mxu0 %v259_v0  ;;  %227 = vmatprep.subr.bf16.mxu1 %v259_v0 }
   0xa   :  { %128 = vmatpush1.bf16.msra.mxu0 %v246_v3  ;;  %236 = vmatpush1.bf16.msra.mxu1 %v246_v3 }
   0xb   :  { %129 = vmatprep.subr.bf16.mxu0 %v259_v0  ;;  %228 = vmatprep.subr.bf16.mxu1 %v259_v0 }
   0xe   :  { %130 = vmatpush1.bf16.msra.mxu0 %v247_v4  ;;  %237 = vmatpush1.bf16.msra.mxu1 %v247_v4 }
   0xf   :  { %131 = vmatprep.subr.bf16.mxu0 %v259_v0  ;;  %229 = vmatprep.subr.bf16.mxu1 %v259_v0 }
  0x12   :  { %132 = vmatpush1.bf16.msra.mxu0 %v248_v7  ;;  %238 = vmatpush1.bf16.msra.mxu1 %v248_v7 }
  0x13   :  { %133 = vmatprep.subr.bf16.mxu0 %v259_v0  ;;  %230 = vmatprep.subr.bf16.mxu1 %v259_v0 }
  0x16   :  { %134 = vmatpush1.bf16.msra.mxu0 %v249_v8  ;;  %239 = vmatpush1.bf16.msra.mxu1 %v249_v8 }
  0x17   :  { %135 = vmatprep.subr.bf16.mxu0 %v259_v0  ;;  %231 = vmatprep.subr.bf16.mxu1 %v259_v0 }
  0x1a   :  { %136 = vmatpush1.bf16.msra.mxu0 %v250_v9  ;;  %240 = vmatpush1.bf16.msra.mxu1 %v250_v9 }
  0x1b   :  { %137 = vmatprep.subr.bf16.mxu0 %v259_v0  ;;  %232 = vmatprep.subr.bf16.mxu1 %v259_v0 }
  0x1e   :  { %138 = vmatpush1.bf16.msra.mxu0 %v251_v10  ;;  %241 = vmatpush1.bf16.msra.mxu1 %v251_v10 }
  0x1f   :  { %139 = vmatprep.subr.bf16.mxu0 %v259_v0  ;;  %233 = vmatprep.subr.bf16.mxu1 %v259_v0 }
  0x22   :  { %140 = vmatpush1.bf16.msra.mxu0 %v252_v11  ;;  %242 = vmatpush1.bf16.msra.mxu1 %v252_v11 }
  0x25   :  { %156 = vmatmul.mubr.bf16.vlgmr.msra.gmra.mrb[0].mxu0 %v253_v12  ;;  %164 = vmatmul.mubr.bf16.vlgmr.msra.gmra.mrb[0].mxu1 %v256_v13 }
  0xf8   :  { %v157_v15 = vpop.f32.mrb[0].mxu0  ;;  %v165_v16 = vpop.f32.mrb[0].mxu1 }
  0xf9   :  { %v158_v17 = vadd.f32 %v201_v14, %v157_v15  ;;  %v166_v18 = vadd.f32 %v201_v14, %v165_v16  ;;  %v159_v19 = vpop.f32.mrb[1].mxu0  ;;  %v167_v20 = vpop.f32.mrb[1].mxu1 }
  0xfa   :  { %v160_v21 = vpop.f32.mrb[2].mxu0  ;;  %v168_v22 = vpop.f32.mrb[2].mxu1 }
  0xfb   :  { %v172_v23 = vmax.f32 %v158_v17, 0.0  ;;  %v174_v24 = vmax.f32 %v166_v18, 0.0  ;;  %v161_v25 = vadd.f32 %v201_v14, %v160_v21  ;;  %v169_v26 = vadd.f32 %v201_v14, %v168_v22  ;;  %v162_v27 = vpop.f32.mrb[3].mxu0  ;;  %v170_v28 = vpop.f32.mrb[3].mxu1 }
  0xfd   :  { %v221_v29 = vpack.c.bf16 %v172_v23, %v172_v23  ;;  %v223_v30 = vpack.c.bf16 %v174_v24, %v174_v24  ;;  %v173_v31 = vmax.f32 %v161_v25, 0.0  ;;  %v175_v32 = vmax.f32 %v169_v26, 0.0 }
  0xff   :  { %193 = vst.msk [vmem:[%s337_s3] sm:$0xf] %vm192_vm1, %v221_v29  ;;  %195 = vst.msk [vmem:[%s337_s3 + $0x8] sm:$0xf] %vm192_vm1, %v223_v30  ;;  %v222_v33 = vpack.c.bf16 %v173_v31, %v173_v31  ;;  %v224_v34 = vpack.c.bf16 %v175_v32, %v175_v32 }
 0x101   :  { %194 = vst.msk [vmem:[%s337_s3 + $0x4] sm:$0xf] %vm192_vm1, %v222_v33  ;;  %196 = vst.msk [vmem:[%s337_s3 + $0xc] sm:$0xf] %vm192_vm1, %v224_v34 }

// kernel: _forward_impl.6
= control target key start
LH: loop header
LB: loop body
LE: loop exit
PB: predicated region body
PF: predicated region fallthrough
CT: control target
= control target key end

     0   :  { %v349_v1 = vmov 0.0   ;;  %vm350_vm0 = vmmov 0   ;;  %vm178_vm1 = vcmask 261120   ;;  %vm264_vm2 = vcmask 519168   ;;  %s437_s1 = inlined_call_operand.vmem [shape: bf16[288,64], index: 1, kind: input, shape index: {}]   ;;  %s438_s0 = inlined_call_operand.vmem [shape: bf16[8,288], index: 0, kind: input, shape index: {}]   ;;  %s439_s2 = inlined_call_operand.vmem [shape: f32[1,64], index: 2, kind: input, shape index: {}]   ;;  %s440_s3 = inlined_call_operand.vmem [shape: bf16[8,64], index: 3, kind: output, shape index: {}]  }
   0x1   :  { %v328_v0 = vld [vmem:[%s437_s1 + $0x40] sm:$0xff]   ;;  %318 = vmatprep.subr.bf16.mxu1 %v349_v1  ;;  %322 = vmatprep.mubr.msk.bf16.mxu1 %vm350_vm0, %v349_v1  ;;  %v330_v3 = vld [vmem:[%s437_s1 + $0x48] sm:$0xff]   ;;  %v332_v5 = vld [vmem:[%s437_s1 + $0x50] sm:$0xff]  }
   0x2   :  { %v329_v2 = vld [vmem:[%s437_s1] sm:$0xff]   ;;  %293 = vmatprep.subr.bf16.mxu0 %v328_v0  ;;  %v331_v4 = vld [vmem:[%s437_s1 + $0x8] sm:$0xff]   ;;  %v333_v6 = vld [vmem:[%s437_s1 + $0x10] sm:$0xff]  }
   0x3   :  { %294 = vmatpush3.bf16.msra.mxu0 %v329_v2  ;;  %v334_v7 = vld [vmem:[%s437_s1 + $0x58] sm:$0xff]   ;;  %v336_v9 = vld [vmem:[%s437_s1 + $0x60] sm:$0xff]   ;;  %v338_v12 = vld [vmem:[%s437_s1 + $0x68] sm:$0xff]  }
   0x4   :  { %295 = vmatprep.subr.bf16.mxu0 %v330_v3  ;;  %v335_v8 = vld [vmem:[%s437_s1 + $0x18] sm:$0xff]   ;;  %v342_v10 = vld [vmem:[%s437_s1 + $0x80] sm:$0xff]   ;;  %v348_v15 = vld [vmem:[%s437_s1 + $0x88] sm:$0xff]  }
   0x5   :  { %v337_v11 = vld [vmem:[%s437_s1 + $0x20] sm:$0xff]   ;;  %319 = vmatpush3.bf16.msra.mxu1 %v342_v10  ;;  %v339_v16 = vld [vmem:[%s437_s1 + $0x28] sm:$0xff]   ;;  %v340_v17 = vld [vmem:[%s437_s1 + $0x70] sm:$0xff]  }
   0x6   :  { %320 = vmatprep.subr.bf16.mxu1 %v349_v1  ;;  %v15_v13 = vld [vmem:[%s438_s0] sm:$0xff]  ;;  %v347_v18 = vld [vmem:[%s438_s0 + $0x8] ss:$0 sps:$4 sm:$0xff]   ;;  %v341_v19 = vld [vmem:[%s437_s1 + $0x30] sm:$0xff]  }
   0x7   :  { %296 = vmatpush3.bf16.msra.mxu0 %v331_v4  ;;  %v272_v14 = vcombine.high %v15_v13, %v15_v13  ;;  %v343_v20 = vld [vmem:[%s437_s1 + $0x78] sm:$0xff]   ;;  %v271_v22 = vcombine.low %v15_v13, %v15_v13  ;;  %v270_v29 = vld [vmem:[%s439_s2] ss:$0 sm:$0xff] }
   0x8   :  { %297 = vmatprep.subr.bf16.mxu0 %v332_v5  ;;  %v344_v21 = vld [vmem:[%s437_s1 + $0x38] sm:$0xff]  }
   0x9   :  { %214 = vmatprep.mubr.bf16.mxu0 %v272_v14  ;;  %321 = vmatpush3.bf16.msra.mxu1 %v348_v15 }
   0xb   :  { %298 = vmatpush3.bf16.msra.mxu0 %v333_v6 }
   0xc   :  { %299 = vmatprep.subr.bf16.mxu0 %v334_v7  ;;  %323 = vmatmul.mubr.msk.bf16.vlgmr.msra.gmra.mrb[0].mxu1 %vm178_vm1, %v347_v18 }
   0xf   :  { %300 = vmatpush3.bf16.msra.mxu0 %v335_v8 }
  0x10   :  { %301 = vmatprep.subr.bf16.mxu0 %v336_v9 }
  0x13   :  { %302 = vmatpush3.bf16.msra.mxu0 %v337_v11 }
  0x14   :  { %303 = vmatprep.subr.bf16.mxu0 %v338_v12 }
  0x17   :  { %304 = vmatpush3.bf16.msra.mxu0 %v339_v16 }
  0x18   :  { %305 = vmatprep.subr.bf16.mxu0 %v340_v17 }
  0x1b   :  { %306 = vmatpush3.bf16.msra.mxu0 %v341_v19 }
  0x1c   :  { %307 = vmatprep.subr.bf16.mxu0 %v343_v20 }
  0x1f   :  { %308 = vmatpush3.bf16.msra.mxu0 %v344_v21 }
  0x22   :  { %215 = vmatmul.mubr.bf16.vlgmr.msra.gmra.mrb[0].mxu0 %v271_v22 }
  0xdf   :  { %v256_v23 = vpop.f32.mrb[0].mxu1 }
  0xe0   :  { %v324_v24 = vpop.f32.mrb[1].mxu1 }
  0xe1   :  { %v259_v25 = vpop.f32.mrb[2].mxu1 }
  0xe2   :  { %v325_v26 = vpop.f32.mrb[3].mxu1 }
  0xf5   :  { %v309_v27 = vpop.f32.mrb[0].mxu0 }
  0xf6   :  { %v310_v28 = vpop.f32.mrb[1].mxu0 }
  0xf7   :  { %v311_v30 = vadd.f32 %v310_v28, %v309_v27  ;;  %v312_v31 = vpop.f32.mrb[2].mxu0 }
  0xf8   :  { %v313_v32 = vpop.f32.mrb[3].mxu0 }
  0xf9   :  { %v217_v33 = vadd.f32 %v311_v30, %v270_v29 }
  0xfb   :  { %v257_v34 = vadd.f32 %v256_v23, %v217_v33 }
  0xfd   :  { %v262_v35 = vmax.f32 %v257_v34, 0.0 }
  0xff   :  { %v263_v36 = vpack.c.bf16 %v262_v35, %v262_v35 }
 0x101   :  { %265 = vst.msk [vmem:[%s440_s3] sm:$0xf] %vm264_vm2, %v263_v36 }

// kernel: _forward_impl.7
= control target key start
LH: loop header
LB: loop body
LE: loop exit
PB: predicated region body
PF: predicated region fallthrough
CT: control target
= control target key end

     0   :  { %v625_v21 = vmov 1966171168   ;;  %v100_v23 = vlaneseq  ;;  %v626_v40 = vmov 0.0   ;;  %vm627_vm0 = vmmov 0   ;;  %s765_s1 = inlined_call_operand.vmem [shape: bf16[576,128], index: 1, kind: input, shape index: {}]   ;;  %s766_s0 = inlined_call_operand.vmem [shape: bf16[2,576], index: 0, kind: input, shape index: {}]   ;;  %s767_s2 = inlined_call_operand.vmem [shape: f32[1,128], index: 2, kind: input, shape index: {}]   ;;  %s768_s3 = inlined_call_operand.vmem [shape: bf16[2,128], index: 3, kind: output, shape index: {}]  }
   0x1   :  { %v588_v0 = vld [vmem:[%s765_s1 + $0x40] sm:$0xff]   ;;  %v592_v4 = vld [vmem:[%s765_s1 + $0x48] sm:$0xff]   ;;  %v596_v8 = vld [vmem:[%s765_s1 + $0x50] sm:$0xff]   ;;  %v98_v22 = vunpack.c.l.s4 %v625_v21  ;;  %vm355_vm1 = vcmask 523264  }
   0x2   :  { %v589_v1 = vld [vmem:[%s765_s1] sm:$0xff]   ;;  %524 = vmatprep.subr.bf16.mxu0 %v588_v0  ;;  %v593_v5 = vld [vmem:[%s765_s1 + $0x8] sm:$0xff]   ;;  %v597_v9 = vld [vmem:[%s765_s1 + $0x10] sm:$0xff]   ;;  %v101_v29 = vshrl.u32 %v100_v23, 7 }
   0x3   :  { %v590_v2 = vld [vmem:[%s765_s1 + $0xc0] sm:$0xff]   ;;  %525 = vmatpush3.bf16.msra.mxu0 %v589_v1  ;;  %v594_v6 = vld [vmem:[%s765_s1 + $0xc8] sm:$0xff]   ;;  %v598_v10 = vld [vmem:[%s765_s1 + $0xd0] sm:$0xff]   ;;  %v99_v28 = vunpack.c.0.s8 %v98_v22 }
   0x4   :  { %v591_v3 = vld [vmem:[%s765_s1 + $0x80] sm:$0xff]   ;;  %546 = vmatprep.subr.bf16.mxu1 %v590_v2  ;;  %526 = vmatprep.subr.bf16.mxu0 %v592_v4  ;;  %v595_v7 = vld [vmem:[%s765_s1 + $0x88] sm:$0xff]   ;;  %v599_v11 = vld [vmem:[%s765_s1 + $0x90] sm:$0xff]  }
   0x5   :  { %547 = vmatpush3.bf16.msra.mxu1 %v591_v3  ;;  %v600_v12 = vld [vmem:[%s765_s1 + $0x58] sm:$0xff]   ;;  %v604_v16 = vld [vmem:[%s765_s1 + $0x60] sm:$0xff]   ;;  %v608_v20 = vld [vmem:[%s765_s1 + $0x68] sm:$0xff]   ;;  %v102_v34 = vsub.s32 %v99_v28, %v101_v29 }
   0x6   :  { %548 = vmatprep.subr.bf16.mxu1 %v594_v6  ;;  %v601_v13 = vld [vmem:[%s765_s1 + $0x18] sm:$0xff]   ;;  %v605_v17 = vld [vmem:[%s765_s1 + $0x20] sm:$0xff]   ;;  %v609_v24 = vld [vmem:[%s765_s1 + $0x28] sm:$0xff]  }
   0x7   :  { %527 = vmatpush3.bf16.msra.mxu0 %v593_v5  ;;  %v602_v14 = vld [vmem:[%s765_s1 + $0xd8] sm:$0xff]   ;;  %v606_v18 = vld [vmem:[%s765_s1 + $0xe0] sm:$0xff]   ;;  %v610_v25 = vld [vmem:[%s765_s1 + $0xe8] sm:$0xff]  }
   0x8   :  { %528 = vmatprep.subr.bf16.mxu0 %v596_v8  ;;  %v603_v15 = vld [vmem:[%s765_s1 + $0x98] sm:$0xff]   ;;  %v607_v19 = vld [vmem:[%s765_s1 + $0xa0] sm:$0xff]   ;;  %v611_v26 = vld [vmem:[%s765_s1 + $0xa8] sm:$0xff]  }
   0x9   :  { %549 = vmatpush3.bf16.msra.mxu1 %v595_v7  ;;  %v612_v27 = vld [vmem:[%s765_s1 + $0x70] sm:$0xff]   ;;  %v616_v33 = vld [vmem:[%s765_s1 + $0x78] sm:$0xff]   ;;  %v15_v37 = vld [vmem:[%s766_s0] sm:$0x1f] }
   0xa   :  { %550 = vmatprep.subr.bf16.mxu1 %v598_v10  ;;  %v613_v30 = vld [vmem:[%s765_s1 + $0x30] sm:$0xff]   ;;  %v617_v35 = vld [vmem:[%s765_s1 + $0x38] sm:$0xff]   ;;  %v103_v38 = vrot.slane %v15_v37, %v102_v34  ;;  %v621_v44 = vld [vmem:[%s765_s1 + $0x100] sm:$0xff]   ;;  %v96_v48 = vcombine.high %v15_v37, %v15_v37 }
   0xb   :  { %529 = vmatpush3.bf16.msra.mxu0 %v597_v9  ;;  %v614_v31 = vld [vmem:[%s765_s1 + $0xf0] sm:$0xff]   ;;  %v618_v36 = vld [vmem:[%s765_s1 + $0xf8] sm:$0xff]   ;;  %v622_v47 = vld [vmem:[%s765_s1 + $0x108] sm:$0xff]  }
   0xc   :  { %530 = vmatprep.subr.bf16.mxu0 %v600_v12  ;;  %v615_v32 = vld [vmem:[%s765_s1 + $0xb0] sm:$0xff]   ;;  %v620_v39 = vld [vmem:[%s765_s1 + $0xb8] sm:$0xff]   ;;  %v111_v41 = vcombine.high %v103_v38, %v103_v38  ;;  %v118_v42 = vrot.slane %v103_v38, %v102_v34  ;;  %v110_v50 = vrot.slane %v96_v48, %v102_v34  ;;  %v486_v54 = vld [vmem:[%s767_s2] ss:$0 sm:$0xff] }
   0xd   :  { %551 = vmatpush3.bf16.msra.mxu1 %v599_v11  ;;  %v623_v49 = vld [vmem:[%s765_s1 + $0x110] sm:$0xff]   ;;  %v624_v51 = vld [vmem:[%s765_s1 + $0x118] sm:$0xff]  }
   0xe   :  { %552 = vmatprep.subr.bf16.mxu1 %v602_v14  ;;  %v132_v43 = vrot.slane %v111_v41, %v102_v34  ;;  %v133_v45 = vcombine.high %v118_v42, %v118_v42  ;;  %v125_v52 = vrot.slane %v110_v50, %v102_v34 }
   0xf   :  { %531 = vmatpush3.bf16.msra.mxu0 %v601_v13 }
  0x10   :  { %532 = vmatprep.subr.bf16.mxu0 %v604_v16  ;;  %391 = vmatprep.mubr.bf16.mxu0 %v132_v43  ;;  %v134_v46 = vcombine.high %v132_v43, %v132_v43 }
  0x11   :  { %553 = vmatpush3.bf16.msra.mxu1 %v603_v15 }
  0x12   :  { %554 = vmatprep.subr.bf16.mxu1 %v606_v18  ;;  %431 = vmatprep.mubr.bf16.mxu1 %v134_v46 }
  0x13   :  { %533 = vmatpush3.bf16.msra.mxu0 %v605_v17 }
  0x14   :  { %534 = vmatprep.subr.bf16.mxu0 %v608_v20 }
  0x15   :  { %555 = vmatpush3.bf16.msra.mxu1 %v607_v19 }
  0x16   :  { %556 = vmatprep.subr.bf16.mxu1 %v610_v25 }
  0x17   :  { %535 = vmatpush3.bf16.msra.mxu0 %v609_v24 }
  0x18   :  { %536 = vmatprep.subr.bf16.mxu0 %v612_v27 }
  0x19   :  { %557 = vmatpush3.bf16.msra.mxu1 %v611_v26 }
  0x1a   :  { %558 = vmatprep.subr.bf16.mxu1 %v614_v31 }
  0x1b   :  { %537 = vmatpush3.bf16.msra.mxu0 %v613_v30 }
  0x1c   :  { %538 = vmatprep.subr.bf16.mxu0 %v616_v33 }
  0x1d   :  { %559 = vmatpush3.bf16.msra.mxu1 %v615_v32 }
  0x1e   :  { %560 = vmatprep.subr.bf16.mxu1 %v618_v36 }
  0x1f   :  { %539 = vmatpush3.bf16.msra.mxu0 %v617_v35 }
  0x20   :  { %573 = vmatprep.subr.bf16.mxu0 %v626_v40 }
  0x21   :  { %561 = vmatpush3.bf16.msra.mxu1 %v620_v39 }
  0x22   :  { %392 = vmatmul.mubr.bf16.vlgmr.msra.gmra.mrb[0].mxu0 %v118_v42 }
  0x23   :  { %574 = vmatpush3.bf16.msra.mxu0 %v621_v44  ;;  %581 = vmatprep.mubr.msk.bf16.mxu0 %vm627_vm0, %v626_v40 }
  0x24   :  { %432 = vmatmul.mubr.bf16.vlgmr.msra.gmra.mrb[0].mxu1 %v133_v45  ;;  %575 = vmatprep.subr.bf16.mxu0 %v626_v40 }
  0x27   :  { %576 = vmatpush3.bf16.msra.mxu0 %v622_v47 }
  0x28   :  { %577 = vmatprep.subr.bf16.mxu0 %v626_v40 }
  0x2b   :  { %578 = vmatpush3.bf16.msra.mxu0 %v623_v49 }
  0x2c   :  { %579 = vmatprep.subr.bf16.mxu0 %v626_v40 }
  0x2f   :  { %580 = vmatpush3.bf16.msra.mxu0 %v624_v51 }
  0x32   :  { %582 = vmatmul.mubr.msk.bf16.vlgmr.msra.gmra.mrb[4].mxu0 %vm355_vm1, %v125_v52 }
  0xf5   :  { %v540_v53 = vpop.f32.mrb[0].mxu0 }
  0xf6   :  { %v541_v55 = vpop.f32.mrb[1].mxu0 }
  0xf7   :  { %v542_v56 = vadd.f32 %v541_v55, %v540_v53  ;;  %v543_v57 = vpop.f32.mrb[2].mxu0  ;;  %v562_v58 = vpop.f32.mrb[0].mxu1 }
  0xf8   :  { %v544_v59 = vpop.f32.mrb[3].mxu0  ;;  %v563_v60 = vpop.f32.mrb[1].mxu1 }
  0xf9   :  { %v394_v61 = vadd.f32 %v542_v56, %v486_v54  ;;  %v564_v62 = vadd.f32 %v563_v60, %v562_v58  ;;  %v565_v63 = vpop.f32.mrb[2].mxu1 }
  0xfa   :  { %v566_v0 = vpop.f32.mrb[3].mxu1 }
  0xfb   :  { %v434_v1 = vadd.f32 %v564_v62, %v394_v61 }
 0x105   :  { %v473_v2 = vpop.f32.mrb[4].mxu0 }
 0x106   :  { %v474_v3 = vadd.f32 %v473_v2, %v434_v1  ;;  %v583_v4 = vpop.f32.mrb[5].mxu0 }
 0x107   :  { %v476_v5 = vpop.f32.mrb[6].mxu0 }
 0x108   :  { %v479_v6 = vmax.f32 %v474_v3, 0.0  ;;  %v584_v7 = vpop.f32.mrb[7].mxu0 }
 0x10a   :  { %v480_v8 = vpack.c.bf16 %v479_v6, %v479_v6 }
 0x10c   :  { %481 = vst [vmem:[%s768_s3] sm:$0x1] %v480_v8 }

</bundles_post_ra>
